<compile_context>
chip_gen: v7x
topology: tpu7x:2x2x1
jax: 0.10.0
libtpu: 0.0.40
codegen_flags: <defaults>
</compile_context>

<pallas_src>
import jax
import jax.numpy as jnp
import numpy as np
from jax.experimental import pallas as pl
from jax.experimental.pallas import tpu as pltpu


def _round_up(x: int, m: int) -> int:
    return ((x + m - 1) // m) * m


def _cdiv(a: int, b: int) -> int:
    return (a + b - 1) // b


# ----------------------------------------------------------------------------------------------
# VMEM sizing helpers (review: footprint-based tile selection, v7x has only 64 MiB physical VMEM)
# ----------------------------------------------------------------------------------------------
def _vmem_bytes_estimate(tile: int, d: int, h: int) -> int:
    """Rough per-step VMEM footprint: double-buffered blocks + activations, counting the
    lane padding of (tile, D<128) / (tile, H<128) blocks to 128 lanes."""
    lanes_d = max(_round_up(d, 128), 128)
    lanes_h = max(_round_up(h, 128), 128)
    f32 = 4
    inputs = 2 * 2 * tile * lanes_d * f32       # obs + next_obs blocks, 2 pipeline buffers each
    acts = 2 * tile * lanes_h * f32             # h_all scratch (both passes)
    acts_tmp = 2 * tile * lanes_h * f32         # compiler temps for the two layer-1 results
    layer2 = 2 * 8 * 2 * tile * f32             # (8, 2*tile) layer-2 result + sliced views
    slabs = 2 * 2 * 8 * tile * f32              # reward/done in-slab + value/adv out-slab, 2 bufs
    margin = 1 << 20                            # weights (w1/b1/w2 << 1 MiB) + misc
    return inputs + acts + acts_tmp + layer2 + slabs + margin


def _pick_tile(n: int, d: int, h: int, tile_n: int, vmem_budget_bytes: int) -> int:
    n128 = _round_up(max(n, 1), 128)
    tile = min(_round_up(max(tile_n, 128), 128), n128)
    # v7x: make sure the "parallel" grid axis has >= 2 steps to shard over both TensorCores
    if n128 >= 2 * 128:
        tile = min(tile, _round_up(_cdiv(n, 2), 128))
    # clamp to the VMEM budget (counts lane padding and double buffering)
    while tile > 128 and _vmem_bytes_estimate(tile, d, h) > vmem_budget_bytes:
        tile -= 128
    return tile


# ----------------------------------------------------------------------------------------------
# Kernel
# ----------------------------------------------------------------------------------------------
def _td_estimate_kernel(
    obs_ref,        # VMEM (TILE_N, D)      input dtype (cast in-kernel)
    next_obs_ref,   # VMEM (TILE_N, D)
    rd_ref,         # VMEM (1, 2, TILE_N)   f32 lane-dense: row 0 = reward, row 1 = done
    w1_ref,         # VMEM (D, H)           f32  (constant index map -> VMEM-resident)
    b1_ref,         # VMEM (1, H)           f32
    w2_ref,         # VMEM (8, H)           f32  (row-replicated w2^T)
    scal_ref,       # SMEM (2,)             f32  [gamma, b2]
    out_ref,        # VMEM (1, 2, TILE_N)   f32  out: row 0 = state_value, row 1 = advantage
    h_all_ref,      # VMEM scratch (2*TILE_N, H) f32: layer-1 activations of both passes
):
    tile = obs_ref.shape[0]
    w1 = w1_ref[...]
    b1 = b1_ref[...]

    # ---- value network, layer 1 (standard MXU form, w1 stationary) ---------------------------
    # obs/next_obs stream straight from HBM with no wrapper-side cast/pad pass; the dtype cast
    # (a no-op for f32 inputs) happens here on the VPU, hidden under the DMA.
    x = obs_ref[...].astype(w1.dtype)
    xn = next_obs_ref[...].astype(w1.dtype)
    h_all_ref[0:tile, :] = jnp.maximum(
        jnp.dot(x, w1, preferred_element_type=jnp.float32) + b1, 0.0)
    h_all_ref[tile:2 * tile, :] = jnp.maximum(
        jnp.dot(xn, w1, preferred_element_type=jnp.float32) + b1, 0.0)

    # ---- value network, layer 2: ONE fused dot over both passes ------------------------------
    # trans_b form (contract H of both operands): result (8, 2*TILE_N) leaves the MXU lane-dense
    # (row 0 = values), so no (N, 1) lane-padded buffers or masked lane-1 stores exist anywhere.
    dn = (((1,), (1,)), ((), ()))
    vv = jax.lax.dot_general(w2_ref[...], h_all_ref[...], dn,
                             preferred_element_type=jnp.float32)     # (8, 2*TILE_N)
    b2 = scal_ref[1]                       # SMEM scalar
    v = vv[0:1, 0:tile] + b2               # (1, TILE_N) lane-dense
    nv = vv[0:1, tile:2 * tile] + b2

    # ---- TD advantage (f32, VPU) --------------------------------------------------------------
    gamma = scal_ref[0]                    # SMEM scalar
    reward = rd_ref[0, 0:1, :]             # (1, TILE_N)
    not_done = 1.0 - rd_ref[0, 1:2, :]

    out_ref[0, 0:1, :] = v
    out_ref[0, 1:2, :] = reward + gamma * not_done * nv - v


# ----------------------------------------------------------------------------------------------
# Wrapper
# ----------------------------------------------------------------------------------------------
def td_estimate(obs, next_obs, reward, done, params, gamma,
                average_rewards=False, tile_n=4096):
    """TDEstimate.forward equivalent (forward only).

    obs, next_obs : [B, T, obs_dim]
    reward, done  : [B, T, 1]  (done may be bool)
    params        : (w1 [D,H], b1 [1,H], w2 [H,1], b2 [1,1]) of the value MLP
    Returns a dict with the keys the torch module persists on the tensordict.
    """
    B, T, D = obs.shape
    N = B * T
    w1, b1, w2, b2 = params
    H = w1.shape[1]

    # -- reward standardization: a global reduction, so it lives in the wrapper (tiny: N elems) --
    r = reward.reshape(N).astype(jnp.float32)
    if average_rewards:
        centered = r - jnp.mean(r)
        var = jnp.sum(centered * centered) / jnp.maximum(N - 1, 1)  # torch .std() is unbiased
        r = centered / jnp.maximum(jnp.sqrt(var), 1e-4)
        # TODO(synk): torch yields NaN for N == 1 (unbiased std of a single element); this guard
        # returns a finite value instead.
    d = done.reshape(N).astype(jnp.float32)

    # -- adaptive, VMEM-aware row tile; >= 2 grid steps when the batch allows it ----------------
    vmem_budget = 36 * 1024 * 1024
    tile = _pick_tile(N, D, H, tile_n, vmem_budget)
    g = _cdiv(N, tile)
    n_slab = g * tile

    # obs / next_obs go into the kernel UNPADDED and UNCAST (no extra full-tensor HBM pass);
    # Pallas' partial-block DMA handles the ragged last tile and the garbage rows are sliced off.
    x = obs.reshape(N, D)
    xn = next_obs.reshape(N, D)

    # only the tiny reward/done vectors are padded; packed into ONE (g, 2, tile) lane-dense slab
    pad = n_slab - N
    if pad:
        r_p = jnp.pad(r, (0, pad))
        d_p = jnp.pad(d, (0, pad), constant_values=1.0)
    else:
        r_p, d_p = r, d
    rd = jnp.stack([r_p.reshape(g, tile), d_p.reshape(g, tile)], axis=1)   # (g, 2, tile)

    w1_f = jnp.asarray(w1, jnp.float32)
    b1_f = jnp.asarray(b1, jnp.float32).reshape(1, H)
    # w2 as a row vector replicated over 8 sublanes (only row 0 of the layer-2 product is used)
    w2_rep = jnp.broadcast_to(jnp.asarray(w2, jnp.float32).reshape(1, H), (8, H))
    scal = jnp.stack([jnp.asarray(gamma, jnp.float32).reshape(()),
                      jnp.asarray(b2, jnp.float32).reshape(())])           # SMEM: [gamma, b2]

    row_spec = pl.BlockSpec((tile, D), lambda i: (i, 0))
    slab_spec = pl.BlockSpec((1, 2, tile), lambda i: (i, 0, 0))

    def const(shape):
        return pl.BlockSpec(shape, lambda i: (0, 0))

    vmem_limit = int(min(48 * 1024 * 1024,
                         max(32 * 1024 * 1024,
                             int(1.25 * _vmem_bytes_estimate(tile, D, H)))))

    out = pl.pallas_call(
        _td_estimate_kernel,
        out_shape=jax.ShapeDtypeStruct((g, 2, tile), jnp.float32),   # [:,0,:] value, [:,1,:] adv
        grid=(g,),
        in_specs=[
            row_spec,                                   # obs
            row_spec,                                   # next_obs
            slab_spec,                                  # packed reward/done
            const((D, H)),                              # w1 (VMEM-resident)
            const((1, H)),                              # b1
            const((8, H)),                              # w2 (row-replicated)
            pl.BlockSpec(memory_space=pltpu.MemorySpace.SMEM),   # [gamma, b2] scalars
        ],
        out_specs=slab_spec,
        scratch_shapes=[pltpu.VMEM((2 * tile, H), jnp.float32)],   # fused layer-1 activations
        compiler_params=pltpu.CompilerParams(
            dimension_semantics=("parallel",),
            vmem_limit_bytes=vmem_limit,
        ),
    )(x, xn, rd, w1_f, b1_f, w2_rep, scal)

    value = out[:, 0, :].reshape(n_slab)[:N].reshape(B, T, 1)
    adv = out[:, 1, :].reshape(n_slab)[:N].reshape(B, T, 1)
    reward_out = r.reshape(B, T, 1)

    # Keys the torch module actually persists: "advantage", "state_value" (written by the
    # value-network call on the input tensordict) and "reward" (rewritten if standardized).
    # next_state_value only lives on the discarded step_td, so it is not an output here.
    # TODO(synk): gradient_mode=True would also expose "value_error" (non-detached advantage);
    # detach/autograd semantics have no meaning in this forward-only kernel.
    return {
        "state_value": value,
        "advantage": adv,
        "reward": reward_out,
    }


# ----------------------------------------------------------------------------------------------
# Reference + tests
# ----------------------------------------------------------------------------------------------
def _reference(obs, next_obs, reward, done, params, gamma, average_rewards=False):
    w1, b1, w2, b2 = params

    def value_net(x):
        h = jnp.maximum(x @ w1 + b1, 0.0)
        return h @ w2 + b2

    B, T, D = obs.shape
    v = value_net(obs.reshape(-1, D)).reshape(B, T, 1)
    nv = value_net(next_obs.reshape(-1, D)).reshape(B, T, 1)
    r = reward.astype(jnp.float32)
    if average_rewards:
        r = r - r.mean()
        r = r / jnp.maximum(r.std(ddof=1), 1e-4)
    adv = r + gamma * (1.0 - done.astype(jnp.float32)) * nv - v
    return {"state_value": v, "advantage": adv, "reward": r}


def _check(out, ref, atol=2e-2, rtol=2e-2):
    # loose tolerance: the MXU / XLA default-precision f32 matmuls may use bf16 passes
    for k in ("state_value", "advantage"):
        np.testing.assert_allclose(np.asarray(out[k]), np.asarray(ref[k]),
                                   rtol=rtol, atol=atol, err_msg=k)
    np.testing.assert_allclose(np.asarray(out["reward"]),
                               np.asarray(ref["reward"]).reshape(out["reward"].shape),
                               rtol=1e-5, atol=1e-5, err_msg="reward")


if __name__ == "__main__":
    key = jax.random.PRNGKey(0)
    B, T, D, H = 2, 8, 32, 32
    gamma = 0.99

    ks = jax.random.split(key, 8)
    obs = jax.random.normal(ks[0], (B, T, D), dtype=jnp.float32)
    next_obs = jax.random.normal(ks[1], (B, T, D), dtype=jnp.float32)
    reward = jax.random.normal(ks[2], (B, T, 1), dtype=jnp.float32)
    done = jax.random.uniform(ks[3], (B, T, 1)) < 0.1  # bool

    # Deterministic synthetic value-network parameters (nn.Linear-style scaling).
    w1 = (jax.random.uniform(ks[4], (D, H), minval=-1.0, maxval=1.0) / jnp.sqrt(D)).astype(jnp.float32)
    b1 = (jax.random.uniform(ks[5], (1, H), minval=-1.0, maxval=1.0) / jnp.sqrt(D)).astype(jnp.float32)
    w2 = (jax.random.uniform(ks[6], (H, 1), minval=-1.0, maxval=1.0) / jnp.sqrt(H)).astype(jnp.float32)
    b2 = (jax.random.uniform(ks[7], (1, 1), minval=-1.0, maxval=1.0) / jnp.sqrt(H)).astype(jnp.float32)
    params = (w1, b1, w2, b2)

    # 1) small single-tile case (g = 1, partial last-and-only block, no wrapper padding of obs)
    out = td_estimate(obs, next_obs, reward, done, params, gamma, average_rewards=False)
    jax.block_until_ready(out)
    _check(out, _reference(obs, next_obs, reward, done, params, gamma, False))

    # 2) reward-standardization path (global mean/std handled in the wrapper)
    out_std = td_estimate(obs, next_obs, reward, done, params, gamma, average_rewards=True)
    jax.block_until_ready(out_std)
    _check(out_std, _reference(obs, next_obs, reward, done, params, gamma, True))

    # 3) ragged multi-step case with the default (adaptive) tile: N = 600 -> tile capped to 384 so
    #    the "parallel" grid has 2 steps; last obs block is partially out of bounds.
    B2, T2 = 3, 200
    obs2 = jax.random.normal(ks[0], (B2, T2, D), dtype=jnp.float32)
    next_obs2 = jax.random.normal(ks[1], (B2, T2, D), dtype=jnp.float32)
    reward2 = jax.random.normal(ks[2], (B2, T2, 1), dtype=jnp.float32)
    done2 = jax.random.uniform(ks[3], (B2, T2, 1)) < 0.1
    out2 = td_estimate(obs2, next_obs2, reward2, done2, params, gamma, average_rewards=False)
    jax.block_until_ready(out2)
    _check(out2, _reference(obs2, next_obs2, reward2, done2, params, gamma, False))

    # 4) explicit small tile: N = 600, tile = 256 -> g = 3 grid steps
    out3 = td_estimate(obs2, next_obs2, reward2, done2, params, gamma,
                       average_rewards=False, tile_n=256)
    jax.block_until_ready(out3)
    _check(out3, _reference(obs2, next_obs2, reward2, done2, params, gamma, False))

    print("KERNEL_OK")
</pallas_src>

<mosaic_0001>
module attributes {stable_mosaic.version = 11 : i64} {
  func.func @_td_estimate_kernel(%arg0: i32, %arg1: memref<128x32xf32, #tpu.memory_space<vmem>>, %arg2: memref<128x32xf32, #tpu.memory_space<vmem>>, %arg3: memref<1x2x128xf32, #tpu.memory_space<vmem>>, %arg4: memref<32x32xf32, #tpu.memory_space<vmem>>, %arg5: memref<1x32xf32, #tpu.memory_space<vmem>>, %arg6: memref<8x32xf32, #tpu.memory_space<vmem>>, %arg7: memref<2xf32, #tpu.memory_space<smem>>, %arg8: memref<1x2x128xf32, #tpu.memory_space<vmem>>, %arg9: memref<256x32xf32, #tpu.memory_space<vmem>>) attributes {dimension_semantics = [#tpu.dimension_semantics<parallel>], iteration_bounds = array<i64: 1>, scalar_prefetch = 0 : i64, scratch_operands = 1 : i64, tpu.core_type = #tpu.core_type<tc>, window_params = [{transform_indices = @transform_0, window_bounds = array<i64: 128, 32>}, {transform_indices = @transform_1, window_bounds = array<i64: 128, 32>}, {transform_indices = @transform_2, window_bounds = array<i64: 1, 2, 128>}, {pipeline_mode = #tpu.pipeline_mode<synchronous>, transform_indices = @transform_3, window_bounds = array<i64: 32, 32>}, {pipeline_mode = #tpu.pipeline_mode<synchronous>, transform_indices = @transform_4, window_bounds = array<i64: 1, 32>}, {pipeline_mode = #tpu.pipeline_mode<synchronous>, transform_indices = @transform_5, window_bounds = array<i64: 8, 32>}, {transform_indices = @transform_6, window_bounds = array<i64: 2>}, {transform_indices = @transform_7, window_bounds = array<i64: 1, 2, 128>}]} {
    %c0 = arith.constant 0 : index
    %c0_0 = arith.constant 0 : index
    %0 = vector.load %arg4[%c0, %c0_0] : memref<32x32xf32, #tpu.memory_space<vmem>>, vector<32x32xf32>
    %c0_1 = arith.constant 0 : index
    %c0_2 = arith.constant 0 : index
    %1 = vector.load %arg5[%c0_1, %c0_2] : memref<1x32xf32, #tpu.memory_space<vmem>>, vector<1x32xf32>
    %c0_3 = arith.constant 0 : index
    %c0_4 = arith.constant 0 : index
    %2 = vector.load %arg1[%c0_3, %c0_4] : memref<128x32xf32, #tpu.memory_space<vmem>>, vector<128x32xf32>
    %c0_5 = arith.constant 0 : index
    %c0_6 = arith.constant 0 : index
    %3 = vector.load %arg2[%c0_5, %c0_6] : memref<128x32xf32, #tpu.memory_space<vmem>>, vector<128x32xf32>
    %cst = arith.constant dense<0.000000e+00> : vector<128x32xf32>
    %4 = tpu.matmul %2, %0, %cst {dimension_numbers = #tpu.dot_dimension_numbers<[1], [0], [0], [1], [0, 0, 1, 1], [], []>} : vector<128x32xf32>, vector<32x32xf32>, vector<128x32xf32> -> vector<128x32xf32>
    %5 = vector.broadcast %1 : vector<1x32xf32> to vector<128x32xf32>
    %6 = arith.addf %4, %5 : vector<128x32xf32>
    %cst_7 = arith.constant 0.000000e+00 : f32
    %7 = vector.broadcast %cst_7 : f32 to vector<128x32xf32>
    %8 = arith.maximumf %6, %7 : vector<128x32xf32>
    %c0_8 = arith.constant 0 : index
    %c0_9 = arith.constant 0 : index
    %9 = vector.load %arg9[%c0_8, %c0_9] : memref<256x32xf32, #tpu.memory_space<vmem>>, vector<128x32xf32>
    tpu.vector_store %arg9[%c0_8, %c0_9], %8 {strides = array<i32>} : memref<256x32xf32, #tpu.memory_space<vmem>>, vector<128x32xf32>,
    %cst_10 = arith.constant dense<0.000000e+00> : vector<128x32xf32>
    %10 = tpu.matmul %3, %0, %cst_10 {dimension_numbers = #tpu.dot_dimension_numbers<[1], [0], [0], [1], [0, 0, 1, 1], [], []>} : vector<128x32xf32>, vector<32x32xf32>, vector<128x32xf32> -> vector<128x32xf32>
    %11 = vector.broadcast %1 : vector<1x32xf32> to vector<128x32xf32>
    %12 = arith.addf %10, %11 : vector<128x32xf32>
    %cst_11 = arith.constant 0.000000e+00 : f32
    %13 = vector.broadcast %cst_11 : f32 to vector<128x32xf32>
    %14 = arith.maximumf %12, %13 : vector<128x32xf32>
    %c128 = arith.constant 128 : index
    %c0_12 = arith.constant 0 : index
    %15 = vector.load %arg9[%c128, %c0_12] : memref<256x32xf32, #tpu.memory_space<vmem>>, vector<128x32xf32>
    tpu.vector_store %arg9[%c128, %c0_12], %14 {strides = array<i32>} : memref<256x32xf32, #tpu.memory_space<vmem>>, vector<128x32xf32>,
    %c0_13 = arith.constant 0 : index
    %c0_14 = arith.constant 0 : index
    %16 = vector.load %arg6[%c0_13, %c0_14] : memref<8x32xf32, #tpu.memory_space<vmem>>, vector<8x32xf32>
    %c0_15 = arith.constant 0 : index
    %c0_16 = arith.constant 0 : index
    %17 = vector.load %arg9[%c0_15, %c0_16] : memref<256x32xf32, #tpu.memory_space<vmem>>, vector<256x32xf32>
    %cst_17 = arith.constant dense<0.000000e+00> : vector<8x256xf32>
    %18 = tpu.matmul %16, %17, %cst_17 {dimension_numbers = #tpu.dot_dimension_numbers<[1], [1], [0], [0], [0, 0, 1, 0], [], []>} : vector<8x32xf32>, vector<256x32xf32>, vector<8x256xf32> -> vector<8x256xf32>
    %c1 = arith.constant 1 : index
    %19 = memref.load %arg7[%c1] : memref<2xf32, #tpu.memory_space<smem>>
    %20 = vector.extract_strided_slice %18 {offsets = [0, 0], sizes = [1, 128], strides = [1, 1]} : vector<8x256xf32> to vector<1x128xf32>
    %21 = vector.broadcast %19 : f32 to vector<1x128xf32>
    %22 = arith.addf %20, %21 : vector<1x128xf32>
    %23 = vector.extract_strided_slice %18 {offsets = [0, 128], sizes = [1, 128], strides = [1, 1]} : vector<8x256xf32> to vector<1x128xf32>
    %24 = vector.broadcast %19 : f32 to vector<1x128xf32>
    %25 = arith.addf %23, %24 : vector<1x128xf32>
    %c0_18 = arith.constant 0 : index
    %26 = memref.load %arg7[%c0_18] : memref<2xf32, #tpu.memory_space<smem>>
    %c0_19 = arith.constant 0 : index
    %c0_20 = arith.constant 0 : index
    %c0_21 = arith.constant 0 : index
    %27 = vector.load %arg3[%c0_19, %c0_20, %c0_21] : memref<1x2x128xf32, #tpu.memory_space<vmem>>, vector<1x1x128xf32>
    %28 = vector.shape_cast %27 : vector<1x1x128xf32> to vector<1x128xf32>
    %c0_22 = arith.constant 0 : index
    %c1_23 = arith.constant 1 : index
    %c0_24 = arith.constant 0 : index
    %29 = vector.load %arg3[%c0_22, %c1_23, %c0_24] : memref<1x2x128xf32, #tpu.memory_space<vmem>>, vector<1x1x128xf32>
    %30 = vector.shape_cast %29 : vector<1x1x128xf32> to vector<1x128xf32>
    %cst_25 = arith.constant 1.000000e+00 : f32
    %31 = vector.broadcast %cst_25 : f32 to vector<1x128xf32>
    %32 = arith.subf %31, %30 : vector<1x128xf32>
    %c0_26 = arith.constant 0 : index
    %c0_27 = arith.constant 0 : index
    %c0_28 = arith.constant 0 : index
    %33 = vector.load %arg8[%c0_26, %c0_27, %c0_28] : memref<1x2x128xf32, #tpu.memory_space<vmem>>, vector<1x1x128xf32>
    %34 = vector.shape_cast %33 : vector<1x1x128xf32> to vector<1x128xf32>
    %35 = vector.shape_cast %22 : vector<1x128xf32> to vector<1x1x128xf32>
    tpu.vector_store %arg8[%c0_26, %c0_27, %c0_28], %35 {strides = array<i32>} : memref<1x2x128xf32, #tpu.memory_space<vmem>>, vector<1x1x128xf32>,
    %36 = vector.broadcast %26 : f32 to vector<1x128xf32>
    %37 = arith.mulf %36, %32 : vector<1x128xf32>
    %38 = arith.mulf %37, %25 : vector<1x128xf32>
    %39 = arith.addf %28, %38 : vector<1x128xf32>
    %40 = arith.subf %39, %22 : vector<1x128xf32>
    %c0_29 = arith.constant 0 : index
    %c1_30 = arith.constant 1 : index
    %c0_31 = arith.constant 0 : index
    %41 = vector.load %arg8[%c0_29, %c1_30, %c0_31] : memref<1x2x128xf32, #tpu.memory_space<vmem>>, vector<1x1x128xf32>
    %42 = vector.shape_cast %41 : vector<1x1x128xf32> to vector<1x128xf32>
    %43 = vector.shape_cast %40 : vector<1x128xf32> to vector<1x1x128xf32>
    tpu.vector_store %arg8[%c0_29, %c1_30, %c0_31], %43 {strides = array<i32>} : memref<1x2x128xf32, #tpu.memory_space<vmem>>, vector<1x1x128xf32>,
    return
  }
  func.func @transform_0(%arg0: i32) -> (i32, i32) {
    %c0_i32 = arith.constant 0 : i32
    %c0_i32_0 = arith.constant 0 : i32
    return %arg0, %c0_i32 : i32, i32
  }
  func.func @transform_1(%arg0: i32) -> (i32, i32) {
    %c0_i32 = arith.constant 0 : i32
    %c0_i32_0 = arith.constant 0 : i32
    return %arg0, %c0_i32 : i32, i32
  }
  func.func @transform_2(%arg0: i32) -> (i32, i32, i32) {
    %c0_i32 = arith.constant 0 : i32
    %c0_i32_0 = arith.constant 0 : i32
    %c0_i32_1 = arith.constant 0 : i32
    return %arg0, %c0_i32, %c0_i32_0 : i32, i32, i32
  }
  func.func @transform_3(%arg0: i32) -> (i32, i32) {
    %c0_i32 = arith.constant 0 : i32
    %c0_i32_0 = arith.constant 0 : i32
    %c0_i32_1 = arith.constant 0 : i32
    return %c0_i32, %c0_i32_0 : i32, i32
  }
  func.func @transform_4(%arg0: i32) -> (i32, i32) {
    %c0_i32 = arith.constant 0 : i32
    %c0_i32_0 = arith.constant 0 : i32
    %c0_i32_1 = arith.constant 0 : i32
    return %c0_i32, %c0_i32_0 : i32, i32
  }
  func.func @transform_5(%arg0: i32) -> (i32, i32) {
    %c0_i32 = arith.constant 0 : i32
    %c0_i32_0 = arith.constant 0 : i32
    %c0_i32_1 = arith.constant 0 : i32
    return %c0_i32, %c0_i32_0 : i32, i32
  }
  func.func @transform_6(%arg0: i32) -> i32 {
    %c0_i32 = arith.constant 0 : i32
    %c0_i32_0 = arith.constant 0 : i32
    return %c0_i32 : i32
  }
  func.func @transform_7(%arg0: i32) -> (i32, i32, i32) {
    %c0_i32 = arith.constant 0 : i32
    %c0_i32_0 = arith.constant 0 : i32
    %c0_i32_1 = arith.constant 0 : i32
    return %arg0, %c0_i32, %c0_i32_0 : i32, i32, i32
  }
}

</mosaic_0001>

<bundles_post_ra>
// kernel: tpu_custom_call.1
= control target key start
LH: loop header
LB: loop body
LE: loop exit
PB: predicated region body
PF: predicated region fallthrough
CT: control target
= control target key end

     0   :  { %12 = vsyncpa [#allocation4], 0  ;;  %s1462_s0 = inlined_call_operand.hbm [shape: f32[16,32], index: 0, kind: input, shape index: {}]   ;;  %s1463_s1 = inlined_call_operand.hbm [shape: f32[16,32], index: 1, kind: input, shape index: {}]   ;;  %s1464_s2 = inlined_call_operand.vmem [shape: f32[1,2,128], index: 2, kind: input, shape index: {}]   ;;  %s1465_s3 = inlined_call_operand.hbm [shape: f32[32,32], index: 3, kind: input, shape index: {}]   ;;  %s1466_s4 = inlined_call_operand.vmem [shape: f32[1,32], index: 4, kind: input, shape index: {}]   ;;  %s1467_s5 = inlined_call_operand.vmem [shape: f32[8,32], index: 5, kind: input, shape index: {}]   ;;  %s1468_s6 = inlined_call_operand.vmem [shape: f32[2], index: 6, kind: input, shape index: {}]   ;;  %s1469_s7 = inlined_call_operand.hbm [shape: f32[1,2,128], index: 7, kind: output, shape index: {}]  }
   0x1   :  { %13 = vsyncpa [#allocation8], 0 }
   0x2   :  { %14 = vsyncpa [#allocation6], 0 }
   0x3   :  { %15 = vsyncpa [#allocation5], 0 }
   0x4   :  { %20 = vsyncadd [#allocation4], 1792  ;;  %s1194_s24 = smov [#allocation3]   ;;  %s1086_s28 = scalar_lea.hbm %s1462_s0, 256 }
   0x5   :  { %s21_s25 = sshll.u32 %s1194_s24, 4  ;;  %p1087_p0 = scmp.ne.s32.totalorder %s1462_s0, %s1086_s28  ;;  %s22_s25 = int_to_ptr.vmem [resolvable:$true] %s21_s25 }
   0x6   :  { %p1090_p1 = scmp.lt.u32.totalorder %s1086_s28, %s1462_s0 }
   0x8   :  { %p1092_p2 = pnand %p1090_p1, %p1087_p0 }
   0xa   :  { %1095 = shalt.err (!%p1092_p2)
}
   0xb   :  { %s1096_s10 = scalar_lea.vmem %s22_s25, 256  ;;  %s1100_s11 = scalar_lea.vmem %s22_s25, 2048 }
   0xc   :  { %p1097_p3 = scmp.ne.s32.totalorder %s22_s25, %s1096_s10  ;;  %p1101_p4 = scmp.lt.s32.totalorder %s22_s25, %s22_s25 }
   0xd   :  { %p1102_p5 = scmp.lt.s32.totalorder %s1100_s11, %s1096_s10 }
   0xf   :  { %p1103_p6 = por %p1102_p5, %p1101_p4 }
  0x11   :  { %p1104_p7 = pnand %p1103_p6, %p1097_p3 }
  0x13   :  { %1107 = shalt.err (!%p1104_p7)
}
  0x14   :  { %s1195_s12 = smov 128   ;;  %s1196_s13 = smov 8  }
  0x15   :  { %27 = dma.hbm_to_vmem [thread:$0]  %s1462_s0, 256, %s22_s25, [#allocation4], %s1195_s12, %s1195_s12, %s1196_s13  }
  0x16   :  { %32 = vsyncadd [#allocation8], 1792  ;;  %s1197_s16 = smov [#allocation7]   ;;  %s1198_s18 = smov [#allocation9]  }
  0x17   :  { %s33_s17 = sshll.u32 %s1197_s16, 4  ;;  %s47_s19 = sshll.u32 %s1198_s18, 4  ;;  %s34_s17 = int_to_ptr.vmem [resolvable:$true] %s33_s17  ;;  %s1256_s19 = int_to_ptr.vmem [resolvable:$true] %s47_s19 }
  0x18   :  { %s1108_s22 = scalar_lea.hbm %s1463_s1, 256 }
  0x19   :  { %p1109_p8 = scmp.ne.s32.totalorder %s1463_s1, %s1108_s22  ;;  %p1112_p9 = scmp.lt.u32.totalorder %s1108_s22, %s1463_s1 }
  0x1b   :  { %p1114_p10 = pnand %p1112_p9, %p1109_p8 }
  0x1d   :  { %1117 = shalt.err (!%p1114_p10)
}
  0x1e   :  { %s1118_s0 = scalar_lea.vmem %s34_s17, 256  ;;  %s1122_s25 = scalar_lea.vmem %s34_s17, 2048 }
  0x1f   :  { %p1119_p11 = scmp.ne.s32.totalorder %s34_s17, %s1118_s0  ;;  %p1123_p12 = scmp.lt.s32.totalorder %s34_s17, %s34_s17 }
  0x20   :  { %p1124_p13 = scmp.lt.s32.totalorder %s1122_s25, %s1118_s0 }
  0x22   :  { %p1125_p0 = por %p1124_p13, %p1123_p12 }
  0x24   :  { %p1126_p1 = pnand %p1125_p0, %p1119_p11 }
  0x26   :  { %1129 = shalt.err (!%p1126_p1)
}
  0x27   :  { %39 = dma.hbm_to_vmem [thread:$0]  %s1463_s1, 256, %s34_s17, [#allocation8], %s1195_s12, %s1195_s12, %s1196_s13  }
  0x28   :  { %s1130_s9 = scalar_lea.hbm %s1465_s3, 512 }
  0x29   :  { %p1131_p2 = scmp.ne.s32.totalorder %s1465_s3, %s1130_s9  ;;  %p1134_p3 = scmp.lt.u32.totalorder %s1130_s9, %s1465_s3 }
  0x2b   :  { %p1136_p4 = pnand %p1134_p3, %p1131_p2 }
  0x2d   :  { %1139 = shalt.err (!%p1136_p4)
}
  0x2e   :  { %s1140_s16 = scalar_lea.vmem %s1256_s19, 512  ;;  %p1145_p6 = scmp.lt.s32.totalorder %s1256_s19, %s1256_s19 }
  0x2f   :  { %p1141_p5 = scmp.ne.s32.totalorder %s1256_s19, %s1140_s16  ;;  %p1146_p7 = scmp.lt.s32.totalorder %s1140_s16, %s1140_s16 }
  0x31   :  { %p1147_p8 = por %p1146_p7, %p1145_p6 }
  0x33   :  { %p1148_p9 = pnand %p1147_p8, %p1141_p5 }
  0x35   :  { %1151 = shalt.err (!%p1148_p9)
}
  0x36   :  { %53 = dma.hbm_to_vmem [thread:$0]  %s1465_s3, 512, %s1256_s19, [#allocation8], %s1195_s12, %s1195_s12, %s1196_s13  }
  0x37   :  { %s64_s21 = sshll.u32 %s1468_s6, 4  ;;  %s65_s21 = int_to_ptr.vmem [resolvable:$true] %s64_s21 }
  0x38   :  { %s1152_s22 = scalar_lea.vmem %s65_s21, 16  ;;  %p1157_p11 = scmp.lt.s32.totalorder %s65_s21, %s65_s21 }
  0x39   :  { %p1153_p10 = scmp.ne.s32.totalorder %s65_s21, %s1152_s22  ;;  %p1158_p12 = scmp.lt.s32.totalorder %s1152_s22, %s1152_s22 }
  0x3b   :  { %p1159_p13 = por %p1158_p12, %p1157_p11 }
  0x3d   :  { %p1160_p0 = pnand %p1159_p13, %p1153_p10 }
  0x3f   :  { %1163 = shalt.err (!%p1160_p0)
}
  0x40   :  { %s1199_s23 = smov [#allocation10]  }
  0x41   :  { %67 = dma.vmem_to_smem %s65_s21, 16, %s1199_s23, [#allocation6]  }
  0x42   :  { %1186 = dma.done.wait [#allocation4], 2048  }
  0x43   :  { %1187 = vsyncadd [#allocation4], 4294965248 }
  0x44   :  { %1188 = dma.done.wait [#allocation8], 2560  }
  0x45   :  { %1189 = vsyncadd [#allocation8], 4294964736 }
  0x46   :  { %1190 = dma.done.wait [#allocation6], 16  }
  0x47   :  { %1191 = vsyncadd [#allocation6], 4294967280 }
  0x48   :  { %80 = sfence }
  0x49   :  { %v81_v0 = vld [vmem:[#allocation9] sm:$0xff]  ;;  %v82_v1 = vld [vmem:[#allocation9 + $0x8] sm:$0xff]  ;;  %v83_v2 = vld [vmem:[#allocation9 + $0x10] sm:$0xff]  ;;  %vm124_vm0 = vcmask 261120   ;;  %s1200_s0 = smov [#allocation11]  }
  0x4a   :  { %v1015_v3 = vpack.c.bf16 %v82_v1, %v81_v0  ;;  %v84_v4 = vld [vmem:[#allocation9 + $0x18] sm:$0xff]  ;;  %v86_v5 = vld [vmem:[#allocation3] sm:$0xff]  ;;  %v87_v7 = vld [vmem:[#allocation3 + $0x8] sm:$0xff]  ;;  %s799_s25 = sshll.u32 %s1200_s0, 4  ;;  %s800_s25 = int_to_ptr.vmem [resolvable:$true] %s799_s25 }
  0x4b   :  { %v1019_v6 = vpack.c.bf16 %v84_v4, %v83_v2  ;;  %959 = vmatprep.mubr.msk.f32.mxu1 %vm124_vm0, %v86_v5  ;;  %v88_v8 = vld [vmem:[#allocation3 + $0x10] sm:$0xff]  ;;  %v89_v9 = vld [vmem:[#allocation3 + $0x18] sm:$0xff]  ;;  %v90_v10 = vld [vmem:[#allocation3 + $0x20] sm:$0xff]  ;;  %s1164_s28 = scalar_lea.vmem %s800_s25, 32  ;;  %p1169_p2 = scmp.lt.s32.totalorder %s800_s25, %s800_s25 }
  0x4c   :  { %1016 = vmatprep.subr.bf16.mxu1 %v1015_v3  ;;  %v91_v11 = vld [vmem:[#allocation3 + $0x28] sm:$0xff]  ;;  %v92_v12 = vld [vmem:[#allocation3 + $0x30] sm:$0xff]  ;;  %v93_v13 = vld [vmem:[#allocation3 + $0x38] sm:$0xff]  ;;  %p1165_p1 = scmp.ne.s32.totalorder %s800_s25, %s1164_s28  ;;  %p1170_p3 = scmp.lt.s32.totalorder %s1164_s28, %s1164_s28 }
  0x4d   :  { %1018 = vmatpush3.bf16.msra.mxu1 %v1015_v3  ;;  %v94_v14 = vld [vmem:[#allocation3 + $0x40] sm:$0xff]  ;;  %v95_v15 = vld [vmem:[#allocation3 + $0x48] sm:$0xff]  ;;  %v96_v16 = vld [vmem:[#allocation3 + $0x50] sm:$0xff] }
  0x4e   :  { %1020 = vmatprep.subr.bf16.mxu1 %v1019_v6  ;;  %v97_v17 = vld [vmem:[#allocation3 + $0x58] sm:$0xff]  ;;  %v98_v18 = vld [vmem:[#allocation3 + $0x60] sm:$0xff]  ;;  %v99_v19 = vld [vmem:[#allocation3 + $0x68] sm:$0xff]  ;;  %p1171_p4 = por %p1170_p3, %p1169_p2 }
  0x4f   :  { %v100_v20 = vld [vmem:[#allocation3 + $0x70] sm:$0xff]  ;;  %v101_v21 = vld [vmem:[#allocation3 + $0x78] sm:$0xff]  ;;  %v102_v22 = vld [vmem:[#allocation7] sm:$0xff] }
  0x50   :  { %v103_v23 = vld [vmem:[#allocation7 + $0x8] sm:$0xff]  ;;  %v104_v24 = vld [vmem:[#allocation7 + $0x10] sm:$0xff]  ;;  %v105_v25 = vld [vmem:[#allocation7 + $0x18] sm:$0xff]  ;;  %p1172_p5 = pnand %p1171_p4, %p1165_p1 }
  0x51   :  { %1022 = vmatpush3.bf16.msra.mxu1 %v1019_v6  ;;  %v106_v26 = vld [vmem:[#allocation7 + $0x20] sm:$0xff]  ;;  %v107_v27 = vld [vmem:[#allocation7 + $0x28] sm:$0xff]  ;;  %v108_v28 = vld [vmem:[#allocation7 + $0x30] sm:$0xff] }
  0x52   :  { %1024 = vmatprep.subr.bf16.mxu1 %v1015_v3  ;;  %v109_v29 = vld [vmem:[#allocation7 + $0x38] sm:$0xff]  ;;  %v110_v30 = vld [vmem:[#allocation7 + $0x40] sm:$0xff]  ;;  %v111_v31 = vld [vmem:[#allocation7 + $0x48] sm:$0xff] }
  0x53   :  { %v112_v32 = vld [vmem:[#allocation7 + $0x50] sm:$0xff]  ;;  %v113_v33 = vld [vmem:[#allocation7 + $0x58] sm:$0xff]  ;;  %v114_v34 = vld [vmem:[#allocation7 + $0x60] sm:$0xff] }
  0x54   :  { %960 = vmatmul.mubr.msk.f32.vlgmr.msra.gmra.mrb[0].mxu1 %vm124_vm0, %v87_v7  ;;  %v115_v35 = vld [vmem:[#allocation7 + $0x68] sm:$0xff]  ;;  %v116_v36 = vld [vmem:[#allocation7 + $0x70] sm:$0xff]  ;;  %v117_v37 = vld [vmem:[#allocation7 + $0x78] sm:$0xff] }
  0x55   :  { %1026 = vmatpush3.bf16.msra.mxu1 %v1015_v3  ;;  %962 = vmatprep.mubr.msk.f32.mxu1 %vm124_vm0, %v88_v8  ;;  %v1331_v38 = vld [vmem:[%s1467_s5] sm:$0xff]  ;;  %vm1385_vm1 = vmpackc.low %vm124_vm0, %vm124_vm0  ;;  %s876_s5 = sld [smem:[#allocation10 + $0x1]] }
  0x56   :  { %1028 = vmatprep.subr.bf16.mxu1 %v1019_v6  ;;  %949 = vmatprep.mubr.msk.f32.mxu0 %vm124_vm0, %v1331_v38  ;;  %v1338_v39 = vld [vmem:[%s1466_s4] ss:$0 sm:$0xff]  ;;  %s782_s4 = sld [smem:[#allocation10]] }
  0x58   :  { %963 = vmatmul.mubr.msk.f32.gmra.mrb[2].mxu1 %vm124_vm0, %v89_v9 }
  0x59   :  { %965 = vmatprep.mubr.msk.f32.mxu1 %vm124_vm0, %v90_v10  ;;  %1030 = vmatpush3.bf16.msra.mxu1 %v1019_v6 }
  0x5c   :  { %966 = vmatmul.mubr.msk.f32.gmra.mrb[4].mxu1 %vm124_vm0, %v91_v11 }
  0x5d   :  { %968 = vmatprep.mubr.msk.f32.mxu1 %vm124_vm0, %v92_v12 }
  0x60   :  { %969 = vmatmul.mubr.msk.f32.gmra.mrb[6].mxu1 %vm124_vm0, %v93_v13 }
  0x61   :  { %971 = vmatprep.mubr.msk.f32.mxu1 %vm124_vm0, %v94_v14 }
  0x64   :  { %972 = vmatmul.mubr.msk.f32.gmra.mrb[8].mxu1 %vm124_vm0, %v95_v15 }
  0x65   :  { %974 = vmatprep.mubr.msk.f32.mxu1 %vm124_vm0, %v96_v16 }
  0x68   :  { %975 = vmatmul.mubr.msk.f32.gmra.mrb[10].mxu1 %vm124_vm0, %v97_v17 }
  0x69   :  { %977 = vmatprep.mubr.msk.f32.mxu1 %vm124_vm0, %v98_v18 }
  0x6c   :  { %978 = vmatmul.mubr.msk.f32.gmra.mrb[12].mxu1 %vm124_vm0, %v99_v19 }
  0x6d   :  { %980 = vmatprep.mubr.msk.f32.mxu1 %vm124_vm0, %v100_v20 }
  0x70   :  { %981 = vmatmul.mubr.msk.f32.gmra.mrb[14].mxu1 %vm124_vm0, %v101_v21 }
  0x71   :  { %991 = vmatprep.mubr.msk.f32.mxu1 %vm124_vm0, %v102_v22 }
  0x74   :  { %992 = vmatmul.mubr.msk.f32.vlgmr.msra.gmra.mrb[16].mxu1 %vm124_vm0, %v103_v23 }
  0x75   :  { %994 = vmatprep.mubr.msk.f32.mxu1 %vm124_vm0, %v104_v24 }
  0x78   :  { %995 = vmatmul.mubr.msk.f32.gmra.mrb[18].mxu1 %vm124_vm0, %v105_v25 }
  0x79   :  { %997 = vmatprep.mubr.msk.f32.mxu1 %vm124_vm0, %v106_v26 }
  0x7c   :  { %998 = vmatmul.mubr.msk.f32.gmra.mrb[20].mxu1 %vm124_vm0, %v107_v27 }
  0x7d   :  { %1000 = vmatprep.mubr.msk.f32.mxu1 %vm124_vm0, %v108_v28 }
  0x80   :  { %1001 = vmatmul.mubr.msk.f32.gmra.mrb[22].mxu1 %vm124_vm0, %v109_v29 }
  0x81   :  { %1003 = vmatprep.mubr.msk.f32.mxu1 %vm124_vm0, %v110_v30 }
  0x84   :  { %1004 = vmatmul.mubr.msk.f32.gmra.mrb[24].mxu1 %vm124_vm0, %v111_v31 }
  0x85   :  { %1006 = vmatprep.mubr.msk.f32.mxu1 %vm124_vm0, %v112_v32 }
  0x88   :  { %1007 = vmatmul.mubr.msk.f32.gmra.mrb[26].mxu1 %vm124_vm0, %v113_v33 }
  0x89   :  { %1009 = vmatprep.mubr.msk.f32.mxu1 %vm124_vm0, %v114_v34 }
  0x8c   :  { %1010 = vmatmul.mubr.msk.f32.gmra.mrb[28].mxu1 %vm124_vm0, %v115_v35 }
  0x8d   :  { %1012 = vmatprep.mubr.msk.f32.mxu1 %vm124_vm0, %v116_v36 }
  0x90   :  { %1013 = vmatmul.mubr.msk.f32.gmra.mrb[30].mxu1 %vm124_vm0, %v117_v37 }
 0x127   :  { %v961_v40 = vpop.f32.mrb[0].mxu1 }
 0x128   :  { %v245_v41 = vadd.f32 %v961_v40, %v1338_v39  ;;  %v239_v42 = vpop.f32.mrb[1].mxu1 }
 0x129   :  { %v240_v43 = vadd.f32 %v1338_v39, %v239_v42 }
 0x12a   :  { %v319_v44 = vmax.f32 %v245_v41, 0.0 }
 0x12b   :  { %v318_v45 = vmax.f32 %v240_v43, 0.0  ;;  %v964_v46 = vpop.f32.mrb[2].mxu1 }
 0x12c   :  { %335 = vst.msk [vmem:[#allocation2 + $0x8] sm:$0xff] %vm124_vm0, %v319_v44  ;;  %v255_v47 = vadd.f32 %v964_v46, %v1338_v39  ;;  %v249_v48 = vpop.f32.mrb[3].mxu1 }
 0x12d   :  { %334 = vst.msk [vmem:[#allocation2] sm:$0xff] %vm124_vm0, %v318_v45  ;;  %v250_v49 = vadd.f32 %v1338_v39, %v249_v48 }
 0x12e   :  { %v321_v50 = vmax.f32 %v255_v47, 0.0 }
 0x12f   :  { %v320_v51 = vmax.f32 %v250_v49, 0.0  ;;  %v967_v52 = vpop.f32.mrb[4].mxu1  ;;  %v783_v49 = vld [vmem:[%s1464_s2] sm:$0x1] }
 0x130   :  { %337 = vst.msk [vmem:[#allocation2 + $0x18] sm:$0xff] %vm124_vm0, %v321_v50  ;;  %v265_v53 = vadd.f32 %v967_v52, %v1338_v39  ;;  %v259_v54 = vpop.f32.mrb[5].mxu1 }
 0x131   :  { %336 = vst.msk [vmem:[#allocation2 + $0x10] sm:$0xff] %vm124_vm0, %v320_v51  ;;  %v260_v55 = vadd.f32 %v1338_v39, %v259_v54 }
 0x132   :  { %v323_v56 = vmax.f32 %v265_v53, 0.0 }
 0x133   :  { %v322_v57 = vmax.f32 %v260_v55, 0.0  ;;  %v970_v58 = vpop.f32.mrb[6].mxu1  ;;  %v577_v46 = vld [vmem:[#allocation2 + $0x8] sm:$0xff] }
 0x134   :  { %339 = vst.msk [vmem:[#allocation2 + $0x28] sm:$0xff] %vm124_vm0, %v323_v56  ;;  %v275_v59 = vadd.f32 %v970_v58, %v1338_v39  ;;  %v269_v60 = vpop.f32.mrb[7].mxu1  ;;  %v576_v45 = vld [vmem:[#allocation2] sm:$0xff] }
 0x135   :  { %338 = vst.msk [vmem:[#allocation2 + $0x20] sm:$0xff] %vm124_vm0, %v322_v57  ;;  %v270_v61 = vadd.f32 %v1338_v39, %v269_v60  ;;  %v1034_v54 = vpack.c.bf16 %v577_v46, %v576_v45 }
 0x136   :  { %v325_v62 = vmax.f32 %v275_v59, 0.0 }
 0x137   :  { %v324_v63 = vmax.f32 %v270_v61, 0.0  ;;  %v973_v0 = vpop.f32.mrb[8].mxu1 }
 0x138   :  { %341 = vst.msk [vmem:[#allocation2 + $0x38] sm:$0xff] %vm124_vm0, %v325_v62  ;;  %v285_v1 = vadd.f32 %v973_v0, %v1338_v39  ;;  %v279_v2 = vpop.f32.mrb[9].mxu1 }
 0x139   :  { %340 = vst.msk [vmem:[#allocation2 + $0x30] sm:$0xff] %vm124_vm0, %v324_v63  ;;  %v280_v3 = vadd.f32 %v1338_v39, %v279_v2  ;;  %v579_v2 = vld [vmem:[#allocation2 + $0x18] sm:$0xff] }
 0x13a   :  { %v327_v4 = vmax.f32 %v285_v1, 0.0  ;;  %v578_v1 = vld [vmem:[#allocation2 + $0x10] sm:$0xff] }
 0x13b   :  { %v326_v5 = vmax.f32 %v280_v3, 0.0  ;;  %v976_v6 = vpop.f32.mrb[10].mxu1 }
 0x13c   :  { %343 = vst.msk [vmem:[#allocation2 + $0x48] sm:$0xff] %vm124_vm0, %v327_v4  ;;  %v295_v7 = vadd.f32 %v976_v6, %v1338_v39  ;;  %v289_v8 = vpop.f32.mrb[11].mxu1 }
 0x13d   :  { %342 = vst.msk [vmem:[#allocation2 + $0x40] sm:$0xff] %vm124_vm0, %v326_v5  ;;  %v290_v9 = vadd.f32 %v1338_v39, %v289_v8 }
 0x13e   :  { %v329_v10 = vmax.f32 %v295_v7, 0.0 }
 0x13f   :  { %v328_v11 = vmax.f32 %v290_v9, 0.0  ;;  %v979_v12 = vpop.f32.mrb[12].mxu1 }
 0x140   :  { %345 = vst.msk [vmem:[#allocation2 + $0x58] sm:$0xff] %vm124_vm0, %v329_v10  ;;  %v305_v13 = vadd.f32 %v979_v12, %v1338_v39  ;;  %v299_v14 = vpop.f32.mrb[13].mxu1 }
 0x141   :  { %344 = vst.msk [vmem:[#allocation2 + $0x50] sm:$0xff] %vm124_vm0, %v328_v11  ;;  %v300_v15 = vadd.f32 %v1338_v39, %v299_v14  ;;  %v1040_v11 = vpack.c.bf16 %v579_v2, %v578_v1 }
 0x142   :  { %v331_v16 = vmax.f32 %v305_v13, 0.0 }
 0x143   :  { %v330_v17 = vmax.f32 %v300_v15, 0.0  ;;  %v982_v18 = vpop.f32.mrb[14].mxu1 }
 0x144   :  { %347 = vst.msk [vmem:[#allocation2 + $0x68] sm:$0xff] %vm124_vm0, %v331_v16  ;;  %v315_v19 = vadd.f32 %v982_v18, %v1338_v39  ;;  %v309_v20 = vpop.f32.mrb[15].mxu1 }
 0x145   :  { %346 = vst.msk [vmem:[#allocation2 + $0x60] sm:$0xff] %vm124_vm0, %v330_v17  ;;  %v310_v21 = vadd.f32 %v1338_v39, %v309_v20 }
 0x146   :  { %v333_v22 = vmax.f32 %v315_v19, 0.0 }
 0x147   :  { %v332_v23 = vmax.f32 %v310_v21, 0.0  ;;  %v993_v24 = vpop.f32.mrb[16].mxu1  ;;  %v580_v21 = vld [vmem:[#allocation2 + $0x20] sm:$0xff] }
 0x148   :  { %349 = vst.msk [vmem:[#allocation2 + $0x78] sm:$0xff] %vm124_vm0, %v333_v22  ;;  %v470_v25 = vadd.f32 %v993_v24, %v1338_v39  ;;  %v464_v26 = vpop.f32.mrb[17].mxu1  ;;  %v581_v22 = vld [vmem:[#allocation2 + $0x28] sm:$0xff] }
 0x149   :  { %348 = vst.msk [vmem:[#allocation2 + $0x70] sm:$0xff] %vm124_vm0, %v332_v23  ;;  %v465_v27 = vadd.f32 %v1338_v39, %v464_v26 }
 0x14a   :  { %v544_v28 = vmax.f32 %v470_v25, 0.0 }
 0x14b   :  { %v543_v29 = vmax.f32 %v465_v27, 0.0  ;;  %v996_v30 = vpop.f32.mrb[18].mxu1 }
 0x14c   :  { %560 = vst.msk [vmem:[#allocation2 + $0x88] sm:$0xff] %vm124_vm0, %v544_v28  ;;  %v480_v31 = vadd.f32 %v996_v30, %v1338_v39  ;;  %v474_v32 = vpop.f32.mrb[19].mxu1 }
 0x14d   :  { %559 = vst.msk [vmem:[#allocation2 + $0x80] sm:$0xff] %vm124_vm0, %v543_v29  ;;  %v475_v33 = vadd.f32 %v1338_v39, %v474_v32  ;;  %v1046_v29 = vpack.c.bf16 %v581_v22, %v580_v21 }
 0x14e   :  { %v546_v34 = vmax.f32 %v480_v31, 0.0 }
 0x14f   :  { %v545_v35 = vmax.f32 %v475_v33, 0.0  ;;  %v999_v36 = vpop.f32.mrb[20].mxu1 }
 0x150   :  { %562 = vst.msk [vmem:[#allocation2 + $0x98] sm:$0xff] %vm124_vm0, %v546_v34  ;;  %v490_v37 = vadd.f32 %v999_v36, %v1338_v39  ;;  %v484_v40 = vpop.f32.mrb[21].mxu1  ;;  %v582_v34 = vld [vmem:[#allocation2 + $0x30] sm:$0xff] }
 0x151   :  { %561 = vst.msk [vmem:[#allocation2 + $0x90] sm:$0xff] %vm124_vm0, %v545_v35  ;;  %v485_v41 = vadd.f32 %v1338_v39, %v484_v40  ;;  %v583_v35 = vld [vmem:[#allocation2 + $0x38] sm:$0xff] }
 0x152   :  { %v548_v42 = vmax.f32 %v490_v37, 0.0  ;;  %v1052_v37 = vpack.c.bf16 %v583_v35, %v582_v34 }
 0x153   :  { %v593_v43 = vld [vmem:[#allocation2 + $0x88] sm:$0xff]  ;;  %v547_v44 = vmax.f32 %v485_v41, 0.0  ;;  %v1002_v47 = vpop.f32.mrb[22].mxu1  ;;  %v584_v41 = vld [vmem:[#allocation2 + $0x40] sm:$0xff] }
 0x154   :  { %564 = vst.msk [vmem:[#allocation2 + $0xa8] sm:$0xff] %vm124_vm0, %v548_v42  ;;  %v592_v48 = vld [vmem:[#allocation2 + $0x80] sm:$0xff]  ;;  %v500_v50 = vadd.f32 %v1002_v47, %v1338_v39  ;;  %v494_v51 = vpop.f32.mrb[23].mxu1  ;;  %v585_v42 = vld [vmem:[#allocation2 + $0x48] sm:$0xff]  ;;  %v586_v47 = vld [vmem:[#allocation2 + $0x50] sm:$0xff] }
 0x155   :  { %v1031_v52 = vpack.c.bf16 %v593_v43, %v592_v48  ;;  %563 = vst.msk [vmem:[#allocation2 + $0xa0] sm:$0xff] %vm124_vm0, %v547_v44  ;;  %v495_v53 = vadd.f32 %v1338_v39, %v494_v51  ;;  %v1058_v44 = vpack.c.bf16 %v585_v42, %v584_v41  ;;  %v587_v48 = vld [vmem:[#allocation2 + $0x58] sm:$0xff] }
 0x156   :  { %v550_v55 = vmax.f32 %v500_v50, 0.0  ;;  %v1064_v51 = vpack.c.bf16 %v587_v48, %v586_v47 }
 0x157   :  { %1033 = vmatprep.subr.msk.bf16.mxu0 %vm1385_vm1, %v1031_v52  ;;  %v595_v56 = vld [vmem:[#allocation2 + $0x98] sm:$0xff]  ;;  %v549_v57 = vmax.f32 %v495_v53, 0.0  ;;  %v1005_v58 = vpop.f32.mrb[24].mxu1 }
 0x158   :  { %1036 = vmatpush3.bf16.xpose.msk.msra.mxu0 %vm1385_vm1, %v1034_v54  ;;  %566 = vst.msk [vmem:[#allocation2 + $0xb8] sm:$0xff] %vm124_vm0, %v550_v55  ;;  %v594_v59 = vld [vmem:[#allocation2 + $0x90] sm:$0xff]  ;;  %v510_v60 = vadd.f32 %v1005_v58, %v1338_v39  ;;  %v504_v61 = vpop.f32.mrb[25].mxu1  ;;  %v588_v54 = vld [vmem:[#allocation2 + $0x60] sm:$0xff]  ;;  %v589_v55 = vld [vmem:[#allocation2 + $0x68] sm:$0xff] }
 0x159   :  { %v1037_v62 = vpack.c.bf16 %v595_v56, %v594_v59  ;;  %565 = vst.msk [vmem:[#allocation2 + $0xb0] sm:$0xff] %vm124_vm0, %v549_v57  ;;  %v505_v63 = vadd.f32 %v1338_v39, %v504_v61  ;;  %v1070_v57 = vpack.c.bf16 %v589_v55, %v588_v54  ;;  %v590_v58 = vld [vmem:[#allocation2 + $0x70] sm:$0xff]  ;;  %v591_v59 = vld [vmem:[#allocation2 + $0x78] sm:$0xff]  ;;  %v784_v61 = vld [vmem:[%s1464_s2 + $0x1] sm:$0x1] }
 0x15a   :  { %v552_v0 = vmax.f32 %v510_v60, 0.0  ;;  %v1076_v60 = vpack.c.bf16 %v591_v59, %v590_v58 }
 0x15b   :  { %1039 = vmatprep.subr.msk.bf16.mxu0 %vm1385_vm1, %v1037_v62  ;;  %v597_v3 = vld [vmem:[#allocation2 + $0xa8] sm:$0xff]  ;;  %v551_v4 = vmax.f32 %v505_v63, 0.0  ;;  %v1008_v5 = vpop.f32.mrb[26].mxu1  ;;  %v785_v62 = vsub.f32 1.0, %v784_v61  ;;  %v787_v63 = vstv %s782_s4 }
 0x15c   :  { %568 = vst.msk [vmem:[#allocation2 + $0xc8] sm:$0xff] %vm124_vm0, %v552_v0  ;;  %v596_v6 = vld [vmem:[#allocation2 + $0xa0] sm:$0xff]  ;;  %v520_v7 = vadd.f32 %v1008_v5, %v1338_v39  ;;  %v514_v8 = vpop.f32.mrb[27].mxu1  ;;  %v779_v0 = vstv %s876_s5 }
 0x15d   :  { %v1043_v9 = vpack.c.bf16 %v597_v3, %v596_v6  ;;  %567 = vst.msk [vmem:[#allocation2 + $0xc0] sm:$0xff] %vm124_vm0, %v551_v4  ;;  %v515_v10 = vadd.f32 %v1338_v39, %v514_v8  ;;  %v788_v2 = vmul.f32 %v787_v63, %v785_v62 }
 0x15e   :  { %v554_v12 = vmax.f32 %v520_v7, 0.0 }
 0x15f   :  { %v553_v13 = vmax.f32 %v515_v10, 0.0  ;;  %v1011_v14 = vpop.f32.mrb[28].mxu1  ;;  %v599_v19 = vld [vmem:[#allocation2 + $0xb8] sm:$0xff] }
 0x160   :  { %1042 = vmatpush3.bf16.xpose.msk.msra.mxu0 %vm1385_vm1, %v1040_v11  ;;  %570 = vst.msk [vmem:[#allocation2 + $0xd8] sm:$0xff] %vm124_vm0, %v554_v12  ;;  %v530_v15 = vadd.f32 %v1011_v14, %v1338_v39  ;;  %v524_v16 = vpop.f32.mrb[29].mxu1  ;;  %v598_v18 = vld [vmem:[#allocation2 + $0xb0] sm:$0xff] }
 0x161   :  { %1045 = vmatprep.subr.msk.bf16.mxu0 %vm1385_vm1, %v1043_v9  ;;  %569 = vst.msk [vmem:[#allocation2 + $0xd0] sm:$0xff] %vm124_vm0, %v553_v13  ;;  %v525_v17 = vadd.f32 %v1338_v39, %v524_v16  ;;  %v1049_v27 = vpack.c.bf16 %v599_v19, %v598_v18 }
 0x162   :  { %v556_v20 = vmax.f32 %v530_v15, 0.0 }
 0x163   :  { %v555_v23 = vmax.f32 %v525_v17, 0.0  ;;  %v1014_v24 = vpop.f32.mrb[30].mxu1  ;;  %v601_v33 = vld [vmem:[#allocation2 + $0xc8] sm:$0xff] }
 0x164   :  { %572 = vst.msk [vmem:[#allocation2 + $0xe8] sm:$0xff] %vm124_vm0, %v556_v20  ;;  %v540_v25 = vadd.f32 %v1014_v24, %v1338_v39  ;;  %v534_v26 = vpop.f32.mrb[31].mxu1  ;;  %v600_v32 = vld [vmem:[#allocation2 + $0xc0] sm:$0xff] }
 0x165   :  { %571 = vst.msk [vmem:[#allocation2 + $0xe0] sm:$0xff] %vm124_vm0, %v555_v23  ;;  %v535_v28 = vadd.f32 %v1338_v39, %v534_v26  ;;  %v1055_v36 = vpack.c.bf16 %v601_v33, %v600_v32 }
 0x166   :  { %v558_v30 = vmax.f32 %v540_v25, 0.0 }
 0x167   :  { %v557_v31 = vmax.f32 %v535_v28, 0.0  ;;  %v603_v40 = vld [vmem:[#allocation2 + $0xd8] sm:$0xff] }
 0x168   :  { %1048 = vmatpush3.bf16.xpose.msk.msra.mxu0 %vm1385_vm1, %v1046_v29  ;;  %574 = vst.msk [vmem:[#allocation2 + $0xf8] sm:$0xff] %vm124_vm0, %v558_v30  ;;  %v602_v39 = vld [vmem:[#allocation2 + $0xd0] sm:$0xff] }
 0x169   :  { %1051 = vmatprep.subr.msk.bf16.mxu0 %vm1385_vm1, %v1049_v27  ;;  %573 = vst.msk [vmem:[#allocation2 + $0xf0] sm:$0xff] %vm124_vm0, %v557_v31  ;;  %v1061_v43 = vpack.c.bf16 %v603_v40, %v602_v39 }
 0x16b   :  { %v605_v46 = vld [vmem:[#allocation2 + $0xe8] sm:$0xff] }
 0x16c   :  { %v604_v45 = vld [vmem:[#allocation2 + $0xe0] sm:$0xff] }
 0x16d   :  { %v1067_v50 = vpack.c.bf16 %v605_v46, %v604_v45 }
 0x16f   :  { %v607_v53 = vld [vmem:[#allocation2 + $0xf8] sm:$0xff] }
 0x170   :  { %1054 = vmatpush3.bf16.xpose.msk.msra.mxu0 %vm1385_vm1, %v1052_v37  ;;  %v606_v52 = vld [vmem:[#allocation2 + $0xf0] sm:$0xff] }
 0x171   :  { %1057 = vmatprep.subr.msk.bf16.mxu0 %vm1385_vm1, %v1055_v36  ;;  %v1073_v56 = vpack.c.bf16 %v607_v53, %v606_v52 }
 0x178   :  { %1060 = vmatpush3.bf16.xpose.msk.msra.mxu0 %vm1385_vm1, %v1058_v44 }
 0x179   :  { %1063 = vmatprep.subr.msk.bf16.mxu0 %vm1385_vm1, %v1061_v43 }
 0x180   :  { %1066 = vmatpush3.bf16.xpose.msk.msra.mxu0 %vm1385_vm1, %v1064_v51 }
 0x181   :  { %1069 = vmatprep.subr.msk.bf16.mxu0 %vm1385_vm1, %v1067_v50 }
 0x188   :  { %1072 = vmatpush3.bf16.xpose.msk.msra.mxu0 %vm1385_vm1, %v1070_v57 }
 0x189   :  { %1075 = vmatprep.subr.msk.bf16.mxu0 %vm1385_vm1, %v1073_v56 }
 0x190   :  { %1078 = vmatpush3.bf16.xpose.msk.msra.mxu0 %vm1385_vm1, %v1076_v60 }
 0x197   :  { %950 = vmatmul.mubr.msk.f32.vlgmr.msra.gmra.mrb[0].mxu0 %vm124_vm0, %v1331_v38 }
 0x26a   :  { %v773_v1 = vpop.f32.mrb[0].mxu0 }
 0x26b   :  { %v780_v3 = vadd.f32 %v779_v0, %v773_v1  ;;  %v775_v4 = vpop.f32.mrb[1].mxu0 }
 0x26c   :  { %v781_v5 = vadd.f32 %v779_v0, %v775_v4 }
 0x26d   :  { %786 = vst [vmem:[#allocation11] sm:$0x1] %v780_v3 }
 0x26e   :  { %v789_v38 = vmul.f32 %v788_v2, %v781_v5 }
 0x270   :  { %v790_v6 = vadd.f32 %v789_v38, %v783_v49 }
 0x272   :  { %v791_v7 = vsub.f32 %v790_v6, %v780_v3 }
 0x274   :  { %792 = vst [vmem:[#allocation11 + $0x1] sm:$0x1] %v791_v7 }
 0x275   :  { %1175 = shalt.err (!%p1172_p5)
}
 0x276   :  { %s1176_s8 = scalar_lea.hbm %s1469_s7, 32 }
 0x277   :  { %p1177_p6 = scmp.ne.s32.totalorder %s1469_s7, %s1176_s8  ;;  %p1180_p7 = scmp.lt.u32.totalorder %s1176_s8, %s1469_s7 }
 0x279   :  { %p1182_p8 = pnand %p1180_p7, %p1177_p6 }
 0x27b   :  { %1185 = shalt.err (!%p1182_p8)
}
 0x27c   :  { %802 = dma.vmem_to_hbm [thread:$0]  %s800_s25, 32, %s1469_s7, [#allocation5]  }
 0x27d   :  { %1192 = dma.done.wait [#allocation5], 32  }
 0x27e   :  { %1193 = vsyncadd [#allocation5], 4294967264 }
 0x27f   :  { %806 = vsyncpa [#allocation4], 1 }
 0x280   :  { %807 = vsyncpa [#allocation8], 1 }
 0x281   :  { %808 = vsyncpa [#allocation5], 1 }
 0x282   :  { %809 = vsyncpa [#allocation6], 1 }

</bundles_post_ra>
